<compile_context>
chip_gen: v5e
topology: v5e:2x2
jax: 0.10.0
libtpu: 0.0.40
codegen_flags: <defaults>
</compile_context>

<pallas_src>
import functools

import jax
import jax.numpy as jnp
from jax.experimental import pallas as pl
from jax.experimental.pallas import tpu as pltpu

# ----------------------------- synthetic small config ------------------------------
VOCAB = 100
D_MODEL = 32
N_HEAD = 2
D_HEAD = 16
D_INNER = 64
N_LAYER = 2
NUM_LABELS = 2
LN_EPS = 1e-12
B = 2
S = 8          # sequence length (qlen == klen, no mems)
P = 2 * S      # relative-position table length (klen + qlen)


# ================================ in-kernel helpers =================================

def _layer_norm(h, g, b):
    """LayerNorm with biased variance (torch.nn.LayerNorm semantics). g, b are [1, D]."""
    mu = jnp.mean(h, axis=-1, keepdims=True)
    var = jnp.mean((h - mu) * (h - mu), axis=-1, keepdims=True)
    return (h - mu) * jax.lax.rsqrt(var + LN_EPS) * g + b


def _gelu(x):
    # TODO(synk): HF XLNet uses exact erf-gelu; tanh approximation used here (Mosaic-safe EUP path).
    return 0.5 * x * (1.0 + jnp.tanh(0.7978845608028654 * (x + 0.044715 * x * x * x)))


# ================================ Pallas kernels ====================================

def _layer_kernel(h_ref, mask_ref, pos_ref, wqkvr_ref, rbias_ref, wo_ref,
                  ff1w_ref, ff1b_ref, ff2w_ref, vecs_ref, o_ref, *, scale):
    """One full XLNet layer for a single batch element (grid axis = batch):
       fused QKVR projection -> relative attention (rel_shift in-kernel) ->
       output projection -> residual+LN1 -> FF(gelu) -> residual+LN2."""
    s = h_ref.shape[1]
    n_head = rbias_ref.shape[0] // 2
    d_head = rbias_ref.shape[1]

    x = h_ref[0]                      # [S, D]
    mask = mask_ref[0]                # [S, S], 1.0 where attention is forbidden
    w = wqkvr_ref[...]                # [D, 4*N*Dh]  (q | k | v | r concatenated -> 128 lanes)
    rb = rbias_ref[...]               # [2*N, Dh]    (r_w_bias rows, then r_r_bias rows)
    vecs = vecs_ref[...]              # [5, D]       (ln1_g, ln1_b, ln2_g, ln2_b, ff2_b)

    # Fused q/k/v/r projection: one MXU pass for the content stream and one for the
    # position stream (the unused quadrants of each product are negligible waste).
    xp = jnp.dot(x, w, preferred_element_type=jnp.float32)             # [S, 4*N*Dh]
    rp = jnp.dot(pos_ref[...], w, preferred_element_type=jnp.float32)  # [P, 4*N*Dh]

    neg = -1e30 * mask

    heads = []
    for hd in range(n_head):          # N_HEAD = 2, statically unrolled
        q = xp[:, hd * d_head:(hd + 1) * d_head]                            # [S, Dh]
        k = xp[:, (n_head + hd) * d_head:(n_head + hd + 1) * d_head]        # [S, Dh]
        v = xp[:, (2 * n_head + hd) * d_head:(2 * n_head + hd + 1) * d_head]
        kr = rp[:, (3 * n_head + hd) * d_head:(3 * n_head + hd + 1) * d_head]  # [P, Dh]
        rwb = rb[hd:hd + 1, :]                                               # [1, Dh]
        rrb = rb[n_head + hd:n_head + hd + 1, :]

        # content term: (q + r_w_bias) @ k^T
        ac = jax.lax.dot_general(q + rwb, k, (((1,), (1,)), ((), ())),
                                 preferred_element_type=jnp.float32)        # [S, S]
        # positional term before shift: (q + r_r_bias) @ kr^T
        bd_raw = jax.lax.dot_general(q + rrb, kr, (((1,), (1,)), ((), ())),
                                     preferred_element_type=jnp.float32)    # [S, P]
        # rel_shift (torch rel_shift_bnij): bd[i, c] = bd_raw[i, klen + c - i], klen == s.
        # Implemented with static lane slices -> stays entirely in vregs.
        bd = jnp.concatenate(
            [bd_raw[i:i + 1, s - i:2 * s - i] for i in range(s)], axis=0)   # [S, S]

        scores = (ac + bd) * scale + neg
        scores = scores - jnp.max(scores, axis=-1, keepdims=True)
        p = jnp.exp(scores)
        p = p * pl.reciprocal(jnp.sum(p, axis=-1, keepdims=True), approx=True)
        heads.append(jnp.dot(p, v, preferred_element_type=jnp.float32))     # [S, Dh]

    attn_vec = jnp.concatenate(heads, axis=1)                               # [S, N*Dh]
    attn_out = jnp.dot(attn_vec, wo_ref[...], preferred_element_type=jnp.float32)  # [S, D]

    # residual + LayerNorm 1 (fused epilogue)
    h1 = _layer_norm(attn_out + x, vecs[0:1, :], vecs[1:2, :])

    # position-wise FF: ff1 -> gelu -> ff2, intermediate stays in VMEM/vregs
    ff = jnp.dot(h1, ff1w_ref[...], preferred_element_type=jnp.float32) + ff1b_ref[...]
    ff = _gelu(ff)
    ff = jnp.dot(ff, ff2w_ref[...], preferred_element_type=jnp.float32) + vecs[4:5, :]

    # residual + LayerNorm 2 (fused epilogue)
    o_ref[0] = _layer_norm(ff + h1, vecs[2:3, :], vecs[3:4, :])


def xlnet_layer(h, mask, pos_emb, wqkvr, rbias, w_o, ff1_w, ff1_b, ff2_w, vecs, scale):
    """h [B,S,D] -> new h [B,S,D]; one pallas_call, gridded (parallel) over batch."""
    bsz, slen, d = h.shape
    plen = pos_emb.shape[0]
    d_inner = ff1_w.shape[1]
    nproj = wqkvr.shape[1]
    kernel = functools.partial(_layer_kernel, scale=scale)
    return pl.pallas_call(
        kernel,
        out_shape=jax.ShapeDtypeStruct((bsz, slen, d), jnp.float32),
        grid=(bsz,),
        in_specs=[
            pl.BlockSpec((1, slen, d), lambda b: (b, 0, 0)),        # h (per-batch block)
            pl.BlockSpec((1, slen, slen), lambda b: (b, 0, 0)),     # mask (per-batch block)
            pl.BlockSpec((plen, d), lambda b: (0, 0)),              # pos_emb (shared)
            pl.BlockSpec((d, nproj), lambda b: (0, 0)),             # fused qkvr weight
            pl.BlockSpec((rbias.shape[0], rbias.shape[1]), lambda b: (0, 0)),
            pl.BlockSpec((w_o.shape[0], d), lambda b: (0, 0)),      # output projection
            pl.BlockSpec((d, d_inner), lambda b: (0, 0)),           # ff1 weight
            pl.BlockSpec((1, d_inner), lambda b: (0, 0)),           # ff1 bias
            pl.BlockSpec((d_inner, d), lambda b: (0, 0)),           # ff2 weight
            pl.BlockSpec((vecs.shape[0], d), lambda b: (0, 0)),     # ln/bias vectors
        ],
        out_specs=pl.BlockSpec((1, slen, d), lambda b: (b, 0, 0)),
        compiler_params=pltpu.CompilerParams(dimension_semantics=("parallel",)),
    )(h, mask, pos_emb, wqkvr, rbias, w_o, ff1_w, ff1_b, ff2_w, vecs)


def _head_kernel(x_ref, ws_ref, bs_ref, wl_ref, bl_ref, o_ref):
    """sequence summary ("last" token already sliced): tanh(x @ Ws + bs) @ Wl + bl."""
    summary = jnp.tanh(
        jnp.dot(x_ref[...], ws_ref[...], preferred_element_type=jnp.float32) + bs_ref[...])
    o_ref[...] = jnp.dot(summary, wl_ref[...], preferred_element_type=jnp.float32) + bl_ref[...]


def classifier_head(last, w_s, b_s, w_l, b_l):
    bsz, d = last.shape
    nl = w_l.shape[1]
    return pl.pallas_call(
        _head_kernel,
        out_shape=jax.ShapeDtypeStruct((bsz, nl), jnp.float32),
        grid=(1,),
        in_specs=[
            pl.BlockSpec((bsz, d), lambda i: (0, 0)),
            pl.BlockSpec((d, d), lambda i: (0, 0)),
            pl.BlockSpec((1, d), lambda i: (0, 0)),
            pl.BlockSpec((d, nl), lambda i: (0, 0)),
            pl.BlockSpec((1, nl), lambda i: (0, 0)),
        ],
        out_specs=pl.BlockSpec((bsz, nl), lambda i: (0, 0)),
    )(last, w_s, b_s, w_l, b_l)


# ================================= JAX glue =========================================

def relative_positional_encoding(qlen, klen, d_model):
    """XLNet attn_type='bi', bi_data=False, clamp_len=-1: pos_seq = klen .. -qlen+1."""
    freq_seq = jnp.arange(0, d_model, 2.0, dtype=jnp.float32)
    inv_freq = 1.0 / (10000.0 ** (freq_seq / d_model))
    pos_seq = jnp.arange(klen, -qlen, -1.0, dtype=jnp.float32)
    sinusoid = jnp.einsum("i,d->id", pos_seq, inv_freq)
    return jnp.concatenate([jnp.sin(sinusoid), jnp.cos(sinusoid)], axis=-1)  # [klen+qlen, d]


def xlnet_forward(params, input_ids, attention_mask):
    """Returns (logits [B, NUM_LABELS], last_hidden [B, S, D_MODEL])."""
    bsz, slen = input_ids.shape
    scale = 1.0 / (D_HEAD ** 0.5)

    # word embedding lookup (dropout skipped: eval mode)
    h = jnp.take(params["word_embedding"], input_ids, axis=0).astype(jnp.float32)  # [B,S,D]

    # XLNet bi-attention mask: mask token j for query i iff j is padding and i != j
    input_mask = 1.0 - attention_mask.astype(jnp.float32)                  # [B, S]
    data_mask = jnp.broadcast_to(input_mask[:, None, :], (bsz, slen, slen))
    non_tgt = data_mask - jnp.eye(slen, dtype=jnp.float32)[None]
    mask = (non_tgt > 0).astype(jnp.float32)                               # [B, i, j]

    pos_emb = relative_positional_encoding(slen, slen, D_MODEL)            # [P, D]

    for layer in params["layers"]:
        # pack per-layer params (cheap, under jit): one 128-lane fused projection weight,
        # one small bias block, one block of D-length vectors.
        wqkvr = jnp.concatenate([layer["q"], layer["k"], layer["v"], layer["r"]], axis=1)
        rbias = jnp.concatenate([layer["r_w_bias"], layer["r_r_bias"]], axis=0)
        vecs = jnp.stack([layer["ln1_g"], layer["ln1_b"], layer["ln2_g"],
                          layer["ln2_b"], layer["ff2_b"]], axis=0)
        h = xlnet_layer(h, mask, pos_emb, wqkvr, rbias, layer["o"],
                        layer["ff1_w"], layer["ff1_b"].reshape(1, -1),
                        layer["ff2_w"], vecs, scale)

    # sequence summary: "last" token -> Linear + tanh -> logits projection (one fused call)
    last = h[:, -1, :]                                                     # [B, D]
    logits = classifier_head(last, params["summary_w"],
                             params["summary_b"].reshape(1, -1),
                             params["logits_w"], params["logits_b"].reshape(1, -1))
    return logits, h


def xlnet_apply(params, input_ids, attention_mask, labels=None, hook=False):
    """Mirrors XLNET.forward: returns logits, or a dict when hook=True."""
    # TODO(synk): loss computation when labels are given is not returned by the torch
    # module either (it returns x['logits']); labels are accepted and ignored here.
    logits, last_hidden = _jitted_forward(params, input_ids, attention_mask)
    if hook:
        return {"pred": jax.device_get(logits),
                "x_flat": jax.device_get(last_hidden[:, -1, :])}
    return logits


_jitted_forward = jax.jit(xlnet_forward)


# ============================== parameter initialization ============================

def init_params(key):
    std = 0.02

    def nrm(shape):
        nonlocal key
        key, sub = jax.random.split(key)
        return std * jax.random.normal(sub, shape, jnp.float32)

    params = {"word_embedding": nrm((VOCAB, D_MODEL))}
    layers = []
    for _ in range(N_LAYER):
        layers.append({
            # q/k/v/r torch params are [D, N, Dh]; stored flattened [D, N*Dh]
            "q": nrm((D_MODEL, N_HEAD * D_HEAD)),
            "k": nrm((D_MODEL, N_HEAD * D_HEAD)),
            "v": nrm((D_MODEL, N_HEAD * D_HEAD)),
            "r": nrm((D_MODEL, N_HEAD * D_HEAD)),
            # o torch param is [D, N, Dh], used as attn_vec @ o^T -> stored [N*Dh, D]
            "o": nrm((N_HEAD * D_HEAD, D_MODEL)),
            "r_w_bias": nrm((N_HEAD, D_HEAD)),
            "r_r_bias": nrm((N_HEAD, D_HEAD)),
            "ln1_g": jnp.ones((D_MODEL,), jnp.float32),
            "ln1_b": jnp.zeros((D_MODEL,), jnp.float32),
            "ff1_w": nrm((D_MODEL, D_INNER)),
            "ff1_b": jnp.zeros((D_INNER,), jnp.float32),
            "ff2_w": nrm((D_INNER, D_MODEL)),
            "ff2_b": jnp.zeros((D_MODEL,), jnp.float32),
            "ln2_g": jnp.ones((D_MODEL,), jnp.float32),
            "ln2_b": jnp.zeros((D_MODEL,), jnp.float32),
        })
    params["layers"] = layers
    params["summary_w"] = nrm((D_MODEL, D_MODEL))
    params["summary_b"] = jnp.zeros((D_MODEL,), jnp.float32)
    params["logits_w"] = nrm((D_MODEL, NUM_LABELS))
    params["logits_b"] = jnp.zeros((NUM_LABELS,), jnp.float32)
    return params


# ===================================== main ==========================================

if __name__ == "__main__":
    params = init_params(jax.random.PRNGKey(0))

    input_ids = jax.random.randint(jax.random.PRNGKey(1), (B, S), 0, VOCAB, dtype=jnp.int32)
    # batch 0: no padding; batch 1: first two positions padded (XLNet pads on the left)
    attention_mask = jnp.ones((B, S), dtype=jnp.int32).at[1, :2].set(0)

    logits = xlnet_apply(params, input_ids, attention_mask)
    jax.block_until_ready(logits)

    hooked = xlnet_apply(params, input_ids, attention_mask, hook=True)
    assert hooked["pred"].shape == (B, NUM_LABELS)
    assert hooked["x_flat"].shape == (B, D_MODEL)
    assert logits.shape == (B, NUM_LABELS)

    print("KERNEL_OK")
</pallas_src>

<mosaic_0001>
module attributes {stable_mosaic.version = 11 : i64} {
  func.func @_head_kernel(%arg0: i32, %arg1: memref<2x32xf32, #tpu.memory_space<vmem>>, %arg2: memref<32x32xf32, #tpu.memory_space<vmem>>, %arg3: memref<1x32xf32, #tpu.memory_space<vmem>>, %arg4: memref<32x2xf32, #tpu.memory_space<vmem>>, %arg5: memref<1x2xf32, #tpu.memory_space<vmem>>, %arg6: memref<2x2xf32, #tpu.memory_space<vmem>>) attributes {dimension_semantics = [#tpu.dimension_semantics<arbitrary>], iteration_bounds = array<i64: 1>, scalar_prefetch = 0 : i64, scratch_operands = 0 : i64, tpu.core_type = #tpu.core_type<tc>, window_params = [{pipeline_mode = #tpu.pipeline_mode<synchronous>, transform_indices = @transform_0, window_bounds = array<i64: 2, 32>}, {pipeline_mode = #tpu.pipeline_mode<synchronous>, transform_indices = @transform_1, window_bounds = array<i64: 32, 32>}, {pipeline_mode = #tpu.pipeline_mode<synchronous>, transform_indices = @transform_2, window_bounds = array<i64: 1, 32>}, {pipeline_mode = #tpu.pipeline_mode<synchronous>, transform_indices = @transform_3, window_bounds = array<i64: 32, 2>}, {pipeline_mode = #tpu.pipeline_mode<synchronous>, transform_indices = @transform_4, window_bounds = array<i64: 1, 2>}, {pipeline_mode = #tpu.pipeline_mode<synchronous>, transform_indices = @transform_5, window_bounds = array<i64: 2, 2>}]} {
    %c0 = arith.constant 0 : index
    %c0_0 = arith.constant 0 : index
    %0 = vector.load %arg1[%c0, %c0_0] : memref<2x32xf32, #tpu.memory_space<vmem>>, vector<2x32xf32>
    %c0_1 = arith.constant 0 : index
    %c0_2 = arith.constant 0 : index
    %1 = vector.load %arg2[%c0_1, %c0_2] : memref<32x32xf32, #tpu.memory_space<vmem>>, vector<32x32xf32>
    %cst = arith.constant dense<0.000000e+00> : vector<2x32xf32>
    %2 = tpu.matmul %0, %1, %cst {dimension_numbers = #tpu.dot_dimension_numbers<[1], [0], [0], [1], [0, 0, 1, 1], [], []>} : vector<2x32xf32>, vector<32x32xf32>, vector<2x32xf32> -> vector<2x32xf32>
    %c0_3 = arith.constant 0 : index
    %c0_4 = arith.constant 0 : index
    %3 = vector.load %arg3[%c0_3, %c0_4] : memref<1x32xf32, #tpu.memory_space<vmem>>, vector<1x32xf32>
    %4 = vector.broadcast %3 : vector<1x32xf32> to vector<2x32xf32>
    %5 = arith.addf %2, %4 : vector<2x32xf32>
    %6 = math.tanh %5 : vector<2x32xf32>
    %c0_5 = arith.constant 0 : index
    %c0_6 = arith.constant 0 : index
    %7 = vector.load %arg4[%c0_5, %c0_6] : memref<32x2xf32, #tpu.memory_space<vmem>>, vector<32x2xf32>
    %cst_7 = arith.constant dense<0.000000e+00> : vector<2x2xf32>
    %8 = tpu.matmul %6, %7, %cst_7 {dimension_numbers = #tpu.dot_dimension_numbers<[1], [0], [0], [1], [0, 0, 1, 1], [], []>} : vector<2x32xf32>, vector<32x2xf32>, vector<2x2xf32> -> vector<2x2xf32>
    %c0_8 = arith.constant 0 : index
    %c0_9 = arith.constant 0 : index
    %9 = vector.load %arg5[%c0_8, %c0_9] : memref<1x2xf32, #tpu.memory_space<vmem>>, vector<1x2xf32>
    %10 = vector.broadcast %9 : vector<1x2xf32> to vector<2x2xf32>
    %11 = arith.addf %8, %10 : vector<2x2xf32>
    %c0_10 = arith.constant 0 : index
    %c0_11 = arith.constant 0 : index
    %12 = vector.load %arg6[%c0_10, %c0_11] : memref<2x2xf32, #tpu.memory_space<vmem>>, vector<2x2xf32>
    tpu.vector_store %arg6[%c0_10, %c0_11], %11 {strides = array<i32>} : memref<2x2xf32, #tpu.memory_space<vmem>>, vector<2x2xf32>,
    return
  }
  func.func @transform_0(%arg0: i32) -> (i32, i32) {
    %c0_i32 = arith.constant 0 : i32
    %c0_i32_0 = arith.constant 0 : i32
    %c0_i32_1 = arith.constant 0 : i32
    return %c0_i32, %c0_i32_0 : i32, i32
  }
  func.func @transform_1(%arg0: i32) -> (i32, i32) {
    %c0_i32 = arith.constant 0 : i32
    %c0_i32_0 = arith.constant 0 : i32
    %c0_i32_1 = arith.constant 0 : i32
    return %c0_i32, %c0_i32_0 : i32, i32
  }
  func.func @transform_2(%arg0: i32) -> (i32, i32) {
    %c0_i32 = arith.constant 0 : i32
    %c0_i32_0 = arith.constant 0 : i32
    %c0_i32_1 = arith.constant 0 : i32
    return %c0_i32, %c0_i32_0 : i32, i32
  }
  func.func @transform_3(%arg0: i32) -> (i32, i32) {
    %c0_i32 = arith.constant 0 : i32
    %c0_i32_0 = arith.constant 0 : i32
    %c0_i32_1 = arith.constant 0 : i32
    return %c0_i32, %c0_i32_0 : i32, i32
  }
  func.func @transform_4(%arg0: i32) -> (i32, i32) {
    %c0_i32 = arith.constant 0 : i32
    %c0_i32_0 = arith.constant 0 : i32
    %c0_i32_1 = arith.constant 0 : i32
    return %c0_i32, %c0_i32_0 : i32, i32
  }
  func.func @transform_5(%arg0: i32) -> (i32, i32) {
    %c0_i32 = arith.constant 0 : i32
    %c0_i32_0 = arith.constant 0 : i32
    %c0_i32_1 = arith.constant 0 : i32
    return %c0_i32, %c0_i32_0 : i32, i32
  }
}

module attributes {stable_mosaic.version = 11 : i64} {
  func.func @_layer_kernel(%arg0: i32, %arg1: memref<1x8x32xf32, #tpu.memory_space<vmem>>, %arg2: memref<1x8x8xf32, #tpu.memory_space<vmem>>, %arg3: memref<16x32xf32, #tpu.memory_space<vmem>>, %arg4: memref<32x128xf32, #tpu.memory_space<vmem>>, %arg5: memref<4x16xf32, #tpu.memory_space<vmem>>, %arg6: memref<32x32xf32, #tpu.memory_space<vmem>>, %arg7: memref<32x64xf32, #tpu.memory_space<vmem>>, %arg8: memref<1x64xf32, #tpu.memory_space<vmem>>, %arg9: memref<64x32xf32, #tpu.memory_space<vmem>>, %arg10: memref<5x32xf32, #tpu.memory_space<vmem>>, %arg11: memref<1x8x32xf32, #tpu.memory_space<vmem>>) attributes {dimension_semantics = [#tpu.dimension_semantics<parallel>], iteration_bounds = array<i64: 2>, scalar_prefetch = 0 : i64, scratch_operands = 0 : i64, tpu.core_type = #tpu.core_type<tc>, window_params = [{transform_indices = @transform_0, window_bounds = array<i64: 1, 8, 32>}, {transform_indices = @transform_1, window_bounds = array<i64: 1, 8, 8>}, {pipeline_mode = #tpu.pipeline_mode<synchronous>, transform_indices = @transform_2, window_bounds = array<i64: 16, 32>}, {pipeline_mode = #tpu.pipeline_mode<synchronous>, transform_indices = @transform_3, window_bounds = array<i64: 32, 128>}, {pipeline_mode = #tpu.pipeline_mode<synchronous>, transform_indices = @transform_4, window_bounds = array<i64: 4, 16>}, {pipeline_mode = #tpu.pipeline_mode<synchronous>, transform_indices = @transform_5, window_bounds = array<i64: 32, 32>}, {pipeline_mode = #tpu.pipeline_mode<synchronous>, transform_indices = @transform_6, window_bounds = array<i64: 32, 64>}, {pipeline_mode = #tpu.pipeline_mode<synchronous>, transform_indices = @transform_7, window_bounds = array<i64: 1, 64>}, {pipeline_mode = #tpu.pipeline_mode<synchronous>, transform_indices = @transform_8, window_bounds = array<i64: 64, 32>}, {pipeline_mode = #tpu.pipeline_mode<synchronous>, transform_indices = @transform_9, window_bounds = array<i64: 5, 32>}, {transform_indices = @transform_10, window_bounds = array<i64: 1, 8, 32>}]} {
    %c0 = arith.constant 0 : index
    %c0_0 = arith.constant 0 : index
    %c0_1 = arith.constant 0 : index
    %0 = vector.load %arg1[%c0, %c0_0, %c0_1] : memref<1x8x32xf32, #tpu.memory_space<vmem>>, vector<1x8x32xf32>
    %1 = vector.shape_cast %0 : vector<1x8x32xf32> to vector<8x32xf32>
    %c0_2 = arith.constant 0 : index
    %c0_3 = arith.constant 0 : index
    %c0_4 = arith.constant 0 : index
    %2 = vector.load %arg2[%c0_2, %c0_3, %c0_4] : memref<1x8x8xf32, #tpu.memory_space<vmem>>, vector<1x8x8xf32>
    %3 = vector.shape_cast %2 : vector<1x8x8xf32> to vector<8x8xf32>
    %c0_5 = arith.constant 0 : index
    %c0_6 = arith.constant 0 : index
    %4 = vector.load %arg4[%c0_5, %c0_6] : memref<32x128xf32, #tpu.memory_space<vmem>>, vector<32x128xf32>
    %c0_7 = arith.constant 0 : index
    %c0_8 = arith.constant 0 : index
    %5 = vector.load %arg5[%c0_7, %c0_8] : memref<4x16xf32, #tpu.memory_space<vmem>>, vector<4x16xf32>
    %c0_9 = arith.constant 0 : index
    %c0_10 = arith.constant 0 : index
    %6 = vector.load %arg10[%c0_9, %c0_10] : memref<5x32xf32, #tpu.memory_space<vmem>>, vector<5x32xf32>
    %cst = arith.constant dense<0.000000e+00> : vector<8x128xf32>
    %7 = tpu.matmul %1, %4, %cst {dimension_numbers = #tpu.dot_dimension_numbers<[1], [0], [0], [1], [0, 0, 1, 1], [], []>} : vector<8x32xf32>, vector<32x128xf32>, vector<8x128xf32> -> vector<8x128xf32>
    %c0_11 = arith.constant 0 : index
    %c0_12 = arith.constant 0 : index
    %8 = vector.load %arg3[%c0_11, %c0_12] : memref<16x32xf32, #tpu.memory_space<vmem>>, vector<16x32xf32>
    %cst_13 = arith.constant dense<0.000000e+00> : vector<16x128xf32>
    %9 = tpu.matmul %8, %4, %cst_13 {dimension_numbers = #tpu.dot_dimension_numbers<[1], [0], [0], [1], [0, 0, 1, 1], [], []>} : vector<16x32xf32>, vector<32x128xf32>, vector<16x128xf32> -> vector<16x128xf32>
    %cst_14 = arith.constant -1.000000e+30 : f32
    %10 = vector.broadcast %cst_14 : f32 to vector<8x8xf32>
    %11 = arith.mulf %10, %3 : vector<8x8xf32>
    %12 = vector.extract_strided_slice %7 {offsets = [0, 0], sizes = [8, 16], strides = [1, 1]} : vector<8x128xf32> to vector<8x16xf32>
    %13 = vector.extract_strided_slice %7 {offsets = [0, 32], sizes = [8, 16], strides = [1, 1]} : vector<8x128xf32> to vector<8x16xf32>
    %14 = vector.extract_strided_slice %7 {offsets = [0, 64], sizes = [8, 16], strides = [1, 1]} : vector<8x128xf32> to vector<8x16xf32>
    %15 = vector.extract_strided_slice %9 {offsets = [0, 96], sizes = [16, 16], strides = [1, 1]} : vector<16x128xf32> to vector<16x16xf32>
    %16 = vector.extract_strided_slice %5 {offsets = [0, 0], sizes = [1, 16], strides = [1, 1]} : vector<4x16xf32> to vector<1x16xf32>
    %17 = vector.extract_strided_slice %5 {offsets = [2, 0], sizes = [1, 16], strides = [1, 1]} : vector<4x16xf32> to vector<1x16xf32>
    %18 = vector.broadcast %16 : vector<1x16xf32> to vector<8x16xf32>
    %19 = arith.addf %12, %18 : vector<8x16xf32>
    %cst_15 = arith.constant dense<0.000000e+00> : vector<8x8xf32>
    %20 = tpu.matmul %19, %13, %cst_15 {dimension_numbers = #tpu.dot_dimension_numbers<[1], [1], [0], [0], [0, 0, 1, 0], [], []>} : vector<8x16xf32>, vector<8x16xf32>, vector<8x8xf32> -> vector<8x8xf32>
    %21 = vector.broadcast %17 : vector<1x16xf32> to vector<8x16xf32>
    %22 = arith.addf %12, %21 : vector<8x16xf32>
    %cst_16 = arith.constant dense<0.000000e+00> : vector<8x16xf32>
    %23 = tpu.matmul %22, %15, %cst_16 {dimension_numbers = #tpu.dot_dimension_numbers<[1], [1], [0], [0], [0, 0, 1, 0], [], []>} : vector<8x16xf32>, vector<16x16xf32>, vector<8x16xf32> -> vector<8x16xf32>
    %24 = vector.extract_strided_slice %23 {offsets = [0, 8], sizes = [1, 8], strides = [1, 1]} : vector<8x16xf32> to vector<1x8xf32>
    %25 = vector.extract_strided_slice %23 {offsets = [1, 7], sizes = [1, 8], strides = [1, 1]} : vector<8x16xf32> to vector<1x8xf32>
    %26 = vector.extract_strided_slice %23 {offsets = [2, 6], sizes = [1, 8], strides = [1, 1]} : vector<8x16xf32> to vector<1x8xf32>
    %27 = vector.extract_strided_slice %23 {offsets = [3, 5], sizes = [1, 8], strides = [1, 1]} : vector<8x16xf32> to vector<1x8xf32>
    %28 = vector.extract_strided_slice %23 {offsets = [4, 4], sizes = [1, 8], strides = [1, 1]} : vector<8x16xf32> to vector<1x8xf32>
    %29 = vector.extract_strided_slice %23 {offsets = [5, 3], sizes = [1, 8], strides = [1, 1]} : vector<8x16xf32> to vector<1x8xf32>
    %30 = vector.extract_strided_slice %23 {offsets = [6, 2], sizes = [1, 8], strides = [1, 1]} : vector<8x16xf32> to vector<1x8xf32>
    %31 = vector.extract_strided_slice %23 {offsets = [7, 1], sizes = [1, 8], strides = [1, 1]} : vector<8x16xf32> to vector<1x8xf32>
    %32 = tpu.concatenate %24, %25, %26, %27, %28, %29, %30, %31 in 0 : vector<1x8xf32>, vector<1x8xf32>, vector<1x8xf32>, vector<1x8xf32>, vector<1x8xf32>, vector<1x8xf32>, vector<1x8xf32>, vector<1x8xf32> -> vector<8x8xf32>
    %33 = arith.addf %20, %32 : vector<8x8xf32>
    %cst_17 = arith.constant 2.500000e-01 : f32
    %34 = vector.broadcast %cst_17 : f32 to vector<8x8xf32>
    %35 = arith.mulf %33, %34 : vector<8x8xf32>
    %36 = arith.addf %35, %11 : vector<8x8xf32>
    %cst_18 = arith.constant dense<0xFF800000> : vector<8xf32>
    %37 = vector.multi_reduction <maximumf>, %36, %cst_18 [1] : vector<8x8xf32> to vector<8xf32>
    %38 = vector.shape_cast %37 : vector<8xf32> to vector<8x1xf32>
    %39 = vector.broadcast %38 : vector<8x1xf32> to vector<8x8xf32>
    %40 = arith.subf %36, %39 : vector<8x8xf32>
    %41 = math.exp %40 : vector<8x8xf32>
    %cst_19 = arith.constant dense<0.000000e+00> : vector<8xf32>
    %42 = vector.multi_reduction <add>, %41, %cst_19 [1] : vector<8x8xf32> to vector<8xf32>
    %43 = vector.shape_cast %42 : vector<8xf32> to vector<8x1xf32>
    %44 = tpu.reciprocal %43 {approx = true} : vector<8x1xf32> -> vector<8x1xf32>
    %45 = vector.broadcast %44 : vector<8x1xf32> to vector<8x8xf32>
    %46 = arith.mulf %41, %45 : vector<8x8xf32>
    %cst_20 = arith.constant dense<0.000000e+00> : vector<8x16xf32>
    %47 = tpu.matmul %46, %14, %cst_20 {dimension_numbers = #tpu.dot_dimension_numbers<[1], [0], [0], [1], [0, 0, 1, 1], [], []>} : vector<8x8xf32>, vector<8x16xf32>, vector<8x16xf32> -> vector<8x16xf32>
    %48 = vector.extract_strided_slice %7 {offsets = [0, 16], sizes = [8, 16], strides = [1, 1]} : vector<8x128xf32> to vector<8x16xf32>
    %49 = vector.extract_strided_slice %7 {offsets = [0, 48], sizes = [8, 16], strides = [1, 1]} : vector<8x128xf32> to vector<8x16xf32>
    %50 = vector.extract_strided_slice %7 {offsets = [0, 80], sizes = [8, 16], strides = [1, 1]} : vector<8x128xf32> to vector<8x16xf32>
    %51 = vector.extract_strided_slice %9 {offsets = [0, 112], sizes = [16, 16], strides = [1, 1]} : vector<16x128xf32> to vector<16x16xf32>
    %52 = vector.extract_strided_slice %5 {offsets = [1, 0], sizes = [1, 16], strides = [1, 1]} : vector<4x16xf32> to vector<1x16xf32>
    %53 = vector.extract_strided_slice %5 {offsets = [3, 0], sizes = [1, 16], strides = [1, 1]} : vector<4x16xf32> to vector<1x16xf32>
    %54 = vector.broadcast %52 : vector<1x16xf32> to vector<8x16xf32>
    %55 = arith.addf %48, %54 : vector<8x16xf32>
    %cst_21 = arith.constant dense<0.000000e+00> : vector<8x8xf32>
    %56 = tpu.matmul %55, %49, %cst_21 {dimension_numbers = #tpu.dot_dimension_numbers<[1], [1], [0], [0], [0, 0, 1, 0], [], []>} : vector<8x16xf32>, vector<8x16xf32>, vector<8x8xf32> -> vector<8x8xf32>
    %57 = vector.broadcast %53 : vector<1x16xf32> to vector<8x16xf32>
    %58 = arith.addf %48, %57 : vector<8x16xf32>
    %cst_22 = arith.constant dense<0.000000e+00> : vector<8x16xf32>
    %59 = tpu.matmul %58, %51, %cst_22 {dimension_numbers = #tpu.dot_dimension_numbers<[1], [1], [0], [0], [0, 0, 1, 0], [], []>} : vector<8x16xf32>, vector<16x16xf32>, vector<8x16xf32> -> vector<8x16xf32>
    %60 = vector.extract_strided_slice %59 {offsets = [0, 8], sizes = [1, 8], strides = [1, 1]} : vector<8x16xf32> to vector<1x8xf32>
    %61 = vector.extract_strided_slice %59 {offsets = [1, 7], sizes = [1, 8], strides = [1, 1]} : vector<8x16xf32> to vector<1x8xf32>
    %62 = vector.extract_strided_slice %59 {offsets = [2, 6], sizes = [1, 8], strides = [1, 1]} : vector<8x16xf32> to vector<1x8xf32>
    %63 = vector.extract_strided_slice %59 {offsets = [3, 5], sizes = [1, 8], strides = [1, 1]} : vector<8x16xf32> to vector<1x8xf32>
    %64 = vector.extract_strided_slice %59 {offsets = [4, 4], sizes = [1, 8], strides = [1, 1]} : vector<8x16xf32> to vector<1x8xf32>
    %65 = vector.extract_strided_slice %59 {offsets = [5, 3], sizes = [1, 8], strides = [1, 1]} : vector<8x16xf32> to vector<1x8xf32>
    %66 = vector.extract_strided_slice %59 {offsets = [6, 2], sizes = [1, 8], strides = [1, 1]} : vector<8x16xf32> to vector<1x8xf32>
    %67 = vector.extract_strided_slice %59 {offsets = [7, 1], sizes = [1, 8], strides = [1, 1]} : vector<8x16xf32> to vector<1x8xf32>
    %68 = tpu.concatenate %60, %61, %62, %63, %64, %65, %66, %67 in 0 : vector<1x8xf32>, vector<1x8xf32>, vector<1x8xf32>, vector<1x8xf32>, vector<1x8xf32>, vector<1x8xf32>, vector<1x8xf32>, vector<1x8xf32> -> vector<8x8xf32>
    %69 = arith.addf %56, %68 : vector<8x8xf32>
    %cst_23 = arith.constant 2.500000e-01 : f32
    %70 = vector.broadcast %cst_23 : f32 to vector<8x8xf32>
    %71 = arith.mulf %69, %70 : vector<8x8xf32>
    %72 = arith.addf %71, %11 : vector<8x8xf32>
    %cst_24 = arith.constant dense<0xFF800000> : vector<8xf32>
    %73 = vector.multi_reduction <maximumf>, %72, %cst_24 [1] : vector<8x8xf32> to vector<8xf32>
    %74 = vector.shape_cast %73 : vector<8xf32> to vector<8x1xf32>
    %75 = vector.broadcast %74 : vector<8x1xf32> to vector<8x8xf32>
    %76 = arith.subf %72, %75 : vector<8x8xf32>
    %77 = math.exp %76 : vector<8x8xf32>
    %cst_25 = arith.constant dense<0.000000e+00> : vector<8xf32>
    %78 = vector.multi_reduction <add>, %77, %cst_25 [1] : vector<8x8xf32> to vector<8xf32>
    %79 = vector.shape_cast %78 : vector<8xf32> to vector<8x1xf32>
    %80 = tpu.reciprocal %79 {approx = true} : vector<8x1xf32> -> vector<8x1xf32>
    %81 = vector.broadcast %80 : vector<8x1xf32> to vector<8x8xf32>
    %82 = arith.mulf %77, %81 : vector<8x8xf32>
    %cst_26 = arith.constant dense<0.000000e+00> : vector<8x16xf32>
    %83 = tpu.matmul %82, %50, %cst_26 {dimension_numbers = #tpu.dot_dimension_numbers<[1], [0], [0], [1], [0, 0, 1, 1], [], []>} : vector<8x8xf32>, vector<8x16xf32>, vector<8x16xf32> -> vector<8x16xf32>
    %84 = tpu.concatenate %47, %83 in 1 : vector<8x16xf32>, vector<8x16xf32> -> vector<8x32xf32>
    %c0_27 = arith.constant 0 : index
    %c0_28 = arith.constant 0 : index
    %85 = vector.load %arg6[%c0_27, %c0_28] : memref<32x32xf32, #tpu.memory_space<vmem>>, vector<32x32xf32>
    %cst_29 = arith.constant dense<0.000000e+00> : vector<8x32xf32>
    %86 = tpu.matmul %84, %85, %cst_29 {dimension_numbers = #tpu.dot_dimension_numbers<[1], [0], [0], [1], [0, 0, 1, 1], [], []>} : vector<8x32xf32>, vector<32x32xf32>, vector<8x32xf32> -> vector<8x32xf32>
    %87 = arith.addf %86, %1 : vector<8x32xf32>
    %88 = vector.extract_strided_slice %6 {offsets = [0, 0], sizes = [1, 32], strides = [1, 1]} : vector<5x32xf32> to vector<1x32xf32>
    %89 = vector.extract_strided_slice %6 {offsets = [1, 0], sizes = [1, 32], strides = [1, 1]} : vector<5x32xf32> to vector<1x32xf32>
    %cst_30 = arith.constant dense<0.000000e+00> : vector<8xf32>
    %90 = vector.multi_reduction <add>, %87, %cst_30 [1] : vector<8x32xf32> to vector<8xf32>
    %91 = vector.shape_cast %90 : vector<8xf32> to vector<8x1xf32>
    %cst_31 = arith.constant 3.200000e+01 : f32
    %92 = vector.broadcast %cst_31 : f32 to vector<8x1xf32>
    %93 = arith.divf %91, %92 : vector<8x1xf32>
    %94 = vector.broadcast %93 : vector<8x1xf32> to vector<8x32xf32>
    %95 = arith.subf %87, %94 : vector<8x32xf32>
    %96 = vector.broadcast %93 : vector<8x1xf32> to vector<8x32xf32>
    %97 = arith.subf %87, %96 : vector<8x32xf32>
    %98 = arith.mulf %95, %97 : vector<8x32xf32>
    %cst_32 = arith.constant dense<0.000000e+00> : vector<8xf32>
    %99 = vector.multi_reduction <add>, %98, %cst_32 [1] : vector<8x32xf32> to vector<8xf32>
    %100 = vector.shape_cast %99 : vector<8xf32> to vector<8x1xf32>
    %cst_33 = arith.constant 3.200000e+01 : f32
    %101 = vector.broadcast %cst_33 : f32 to vector<8x1xf32>
    %102 = arith.divf %100, %101 : vector<8x1xf32>
    %103 = vector.broadcast %93 : vector<8x1xf32> to vector<8x32xf32>
    %104 = arith.subf %87, %103 : vector<8x32xf32>
    %cst_34 = arith.constant 9.99999996E-13 : f32
    %105 = vector.broadcast %cst_34 : f32 to vector<8x1xf32>
    %106 = arith.addf %102, %105 : vector<8x1xf32>
    %107 = math.rsqrt %106 : vector<8x1xf32>
    %108 = vector.broadcast %107 : vector<8x1xf32> to vector<8x32xf32>
    %109 = arith.mulf %104, %108 : vector<8x32xf32>
    %110 = vector.broadcast %88 : vector<1x32xf32> to vector<8x32xf32>
    %111 = arith.mulf %109, %110 : vector<8x32xf32>
    %112 = vector.broadcast %89 : vector<1x32xf32> to vector<8x32xf32>
    %113 = arith.addf %111, %112 : vector<8x32xf32>
    %c0_35 = arith.constant 0 : index
    %c0_36 = arith.constant 0 : index
    %114 = vector.load %arg7[%c0_35, %c0_36] : memref<32x64xf32, #tpu.memory_space<vmem>>, vector<32x64xf32>
    %cst_37 = arith.constant dense<0.000000e+00> : vector<8x64xf32>
    %115 = tpu.matmul %113, %114, %cst_37 {dimension_numbers = #tpu.dot_dimension_numbers<[1], [0], [0], [1], [0, 0, 1, 1], [], []>} : vector<8x32xf32>, vector<32x64xf32>, vector<8x64xf32> -> vector<8x64xf32>
    %c0_38 = arith.constant 0 : index
    %c0_39 = arith.constant 0 : index
    %116 = vector.load %arg8[%c0_38, %c0_39] : memref<1x64xf32, #tpu.memory_space<vmem>>, vector<1x64xf32>
    %117 = vector.broadcast %116 : vector<1x64xf32> to vector<8x64xf32>
    %118 = arith.addf %115, %117 : vector<8x64xf32>
    %cst_40 = arith.constant 5.000000e-01 : f32
    %119 = vector.broadcast %cst_40 : f32 to vector<8x64xf32>
    %120 = arith.mulf %119, %118 : vector<8x64xf32>
    %cst_41 = arith.constant 4.471500e-02 : f32
    %121 = vector.broadcast %cst_41 : f32 to vector<8x64xf32>
    %122 = arith.mulf %121, %118 : vector<8x64xf32>
    %123 = arith.mulf %122, %118 : vector<8x64xf32>
    %124 = arith.mulf %123, %118 : vector<8x64xf32>
    %125 = arith.addf %118, %124 : vector<8x64xf32>
    %cst_42 = arith.constant 0.797884583 : f32
    %126 = vector.broadcast %cst_42 : f32 to vector<8x64xf32>
    %127 = arith.mulf %126, %125 : vector<8x64xf32>
    %128 = math.tanh %127 : vector<8x64xf32>
    %cst_43 = arith.constant 1.000000e+00 : f32
    %129 = vector.broadcast %cst_43 : f32 to vector<8x64xf32>
    %130 = arith.addf %129, %128 : vector<8x64xf32>
    %131 = arith.mulf %120, %130 : vector<8x64xf32>
    %c0_44 = arith.constant 0 : index
    %c0_45 = arith.constant 0 : index
    %132 = vector.load %arg9[%c0_44, %c0_45] : memref<64x32xf32, #tpu.memory_space<vmem>>, vector<64x32xf32>
    %cst_46 = arith.constant dense<0.000000e+00> : vector<8x32xf32>
    %133 = tpu.matmul %131, %132, %cst_46 {dimension_numbers = #tpu.dot_dimension_numbers<[1], [0], [0], [1], [0, 0, 1, 1], [], []>} : vector<8x64xf32>, vector<64x32xf32>, vector<8x32xf32> -> vector<8x32xf32>
    %134 = vector.extract_strided_slice %6 {offsets = [4, 0], sizes = [1, 32], strides = [1, 1]} : vector<5x32xf32> to vector<1x32xf32>
    %135 = vector.broadcast %134 : vector<1x32xf32> to vector<8x32xf32>
    %136 = arith.addf %133, %135 : vector<8x32xf32>
    %137 = arith.addf %136, %113 : vector<8x32xf32>
    %138 = vector.extract_strided_slice %6 {offsets = [2, 0], sizes = [1, 32], strides = [1, 1]} : vector<5x32xf32> to vector<1x32xf32>
    %139 = vector.extract_strided_slice %6 {offsets = [3, 0], sizes = [1, 32], strides = [1, 1]} : vector<5x32xf32> to vector<1x32xf32>
    %cst_47 = arith.constant dense<0.000000e+00> : vector<8xf32>
    %140 = vector.multi_reduction <add>, %137, %cst_47 [1] : vector<8x32xf32> to vector<8xf32>
    %141 = vector.shape_cast %140 : vector<8xf32> to vector<8x1xf32>
    %cst_48 = arith.constant 3.200000e+01 : f32
    %142 = vector.broadcast %cst_48 : f32 to vector<8x1xf32>
    %143 = arith.divf %141, %142 : vector<8x1xf32>
    %144 = vector.broadcast %143 : vector<8x1xf32> to vector<8x32xf32>
    %145 = arith.subf %137, %144 : vector<8x32xf32>
    %146 = vector.broadcast %143 : vector<8x1xf32> to vector<8x32xf32>
    %147 = arith.subf %137, %146 : vector<8x32xf32>
    %148 = arith.mulf %145, %147 : vector<8x32xf32>
    %cst_49 = arith.constant dense<0.000000e+00> : vector<8xf32>
    %149 = vector.multi_reduction <add>, %148, %cst_49 [1] : vector<8x32xf32> to vector<8xf32>
    %150 = vector.shape_cast %149 : vector<8xf32> to vector<8x1xf32>
    %cst_50 = arith.constant 3.200000e+01 : f32
    %151 = vector.broadcast %cst_50 : f32 to vector<8x1xf32>
    %152 = arith.divf %150, %151 : vector<8x1xf32>
    %153 = vector.broadcast %143 : vector<8x1xf32> to vector<8x32xf32>
    %154 = arith.subf %137, %153 : vector<8x32xf32>
    %cst_51 = arith.constant 9.99999996E-13 : f32
    %155 = vector.broadcast %cst_51 : f32 to vector<8x1xf32>
    %156 = arith.addf %152, %155 : vector<8x1xf32>
    %157 = math.rsqrt %156 : vector<8x1xf32>
    %158 = vector.broadcast %157 : vector<8x1xf32> to vector<8x32xf32>
    %159 = arith.mulf %154, %158 : vector<8x32xf32>
    %160 = vector.broadcast %138 : vector<1x32xf32> to vector<8x32xf32>
    %161 = arith.mulf %159, %160 : vector<8x32xf32>
    %162 = vector.broadcast %139 : vector<1x32xf32> to vector<8x32xf32>
    %163 = arith.addf %161, %162 : vector<8x32xf32>
    %c0_52 = arith.constant 0 : index
    %c0_53 = arith.constant 0 : index
    %c0_54 = arith.constant 0 : index
    %164 = vector.load %arg11[%c0_52, %c0_53, %c0_54] : memref<1x8x32xf32, #tpu.memory_space<vmem>>, vector<1x8x32xf32>
    %165 = vector.shape_cast %164 : vector<1x8x32xf32> to vector<8x32xf32>
    %166 = vector.shape_cast %163 : vector<8x32xf32> to vector<1x8x32xf32>
    tpu.vector_store %arg11[%c0_52, %c0_53, %c0_54], %166 {strides = array<i32>} : memref<1x8x32xf32, #tpu.memory_space<vmem>>, vector<1x8x32xf32>,
    return
  }
  func.func @transform_0(%arg0: i32) -> (i32, i32, i32) {
    %c0_i32 = arith.constant 0 : i32
    %c0_i32_0 = arith.constant 0 : i32
    %c0_i32_1 = arith.constant 0 : i32
    return %arg0, %c0_i32, %c0_i32_0 : i32, i32, i32
  }
  func.func @transform_1(%arg0: i32) -> (i32, i32, i32) {
    %c0_i32 = arith.constant 0 : i32
    %c0_i32_0 = arith.constant 0 : i32
    %c0_i32_1 = arith.constant 0 : i32
    return %arg0, %c0_i32, %c0_i32_0 : i32, i32, i32
  }
  func.func @transform_2(%arg0: i32) -> (i32, i32) {
    %c0_i32 = arith.constant 0 : i32
    %c0_i32_0 = arith.constant 0 : i32
    %c0_i32_1 = arith.constant 0 : i32
    return %c0_i32, %c0_i32_0 : i32, i32
  }
  func.func @transform_3(%arg0: i32) -> (i32, i32) {
    %c0_i32 = arith.constant 0 : i32
    %c0_i32_0 = arith.constant 0 : i32
    %c0_i32_1 = arith.constant 0 : i32
    return %c0_i32, %c0_i32_0 : i32, i32
  }
  func.func @transform_4(%arg0: i32) -> (i32, i32) {
    %c0_i32 = arith.constant 0 : i32
    %c0_i32_0 = arith.constant 0 : i32
    %c0_i32_1 = arith.constant 0 : i32
    return %c0_i32, %c0_i32_0 : i32, i32
  }
  func.func @transform_5(%arg0: i32) -> (i32, i32) {
    %c0_i32 = arith.constant 0 : i32
    %c0_i32_0 = arith.constant 0 : i32
    %c0_i32_1 = arith.constant 0 : i32
    return %c0_i32, %c0_i32_0 : i32, i32
  }
  func.func @transform_6(%arg0: i32) -> (i32, i32) {
    %c0_i32 = arith.constant 0 : i32
    %c0_i32_0 = arith.constant 0 : i32
    %c0_i32_1 = arith.constant 0 : i32
    return %c0_i32, %c0_i32_0 : i32, i32
  }
  func.func @transform_7(%arg0: i32) -> (i32, i32) {
    %c0_i32 = arith.constant 0 : i32
    %c0_i32_0 = arith.constant 0 : i32
    %c0_i32_1 = arith.constant 0 : i32
    return %c0_i32, %c0_i32_0 : i32, i32
  }
  func.func @transform_8(%arg0: i32) -> (i32, i32) {
    %c0_i32 = arith.constant 0 : i32
    %c0_i32_0 = arith.constant 0 : i32
    %c0_i32_1 = arith.constant 0 : i32
    return %c0_i32, %c0_i32_0 : i32, i32
  }
  func.func @transform_9(%arg0: i32) -> (i32, i32) {
    %c0_i32 = arith.constant 0 : i32
    %c0_i32_0 = arith.constant 0 : i32
    %c0_i32_1 = arith.constant 0 : i32
    return %c0_i32, %c0_i32_0 : i32, i32
  }
  func.func @transform_10(%arg0: i32) -> (i32, i32, i32) {
    %c0_i32 = arith.constant 0 : i32
    %c0_i32_0 = arith.constant 0 : i32
    %c0_i32_1 = arith.constant 0 : i32
    return %arg0, %c0_i32, %c0_i32_0 : i32, i32, i32
  }
}

</mosaic_0001>

<bundles_post_ra>
// kernel: xlnet_forward.5
= control target key start
LH: loop header
LB: loop body
LE: loop exit
PB: predicated region body
PF: predicated region fallthrough
CT: control target
= control target key end

     0   :  { %s206_s0 = inlined_call_operand.vmem [shape: f32[2,32], index: 0, kind: input, shape index: {}]   ;;  %s207_s1 = inlined_call_operand.vmem [shape: f32[32,32], index: 1, kind: input, shape index: {}]   ;;  %s208_s2 = inlined_call_operand.vmem [shape: f32[1,32], index: 2, kind: input, shape index: {}]   ;;  %s209_s3 = inlined_call_operand.vmem [shape: f32[32,2], index: 3, kind: input, shape index: {}]   ;;  %s210_s4 = inlined_call_operand.vmem [shape: f32[1,2], index: 4, kind: input, shape index: {}]   ;;  %s211_s5 = inlined_call_operand.hbm [shape: f32[2,2], index: 5, kind: output, shape index: {}]  }
   0x1   :  { %v25_v0 = vld [vmem:[%s207_s1 + $0x18] sm:$0xff]  ;;  %v24_v1 = vld [vmem:[%s207_s1 + $0x10] sm:$0xff]  ;;  %v23_v2 = vld [vmem:[%s207_s1 + $0x8] sm:$0xff] }
   0x2   :  { %46 = vmatpush.msra.mxu0 %v25_v0 }
   0x3   :  { %10 = vsyncpa [#allocation3], 0  ;;  %v22_v3 = vld [vmem:[%s207_s1] sm:$0xff]  ;;  %vm30_vm0 = vcmask 261120   ;;  %v58_v5 = vld [vmem:[%s209_s3 + $0x18] sm:$0xff]  ;;  %s137_s13 = smov [#allocation2]  }
   0x4   :  { %47 = vmatpush.msra.mxu0 %v24_v1  ;;  %v21_v4 = vld [vmem:[%s206_s0] sm:$0x3]  ;;  %78 = vmatpush.msra.mxu1 %v58_v5  ;;  %v57_v6 = vld [vmem:[%s209_s3 + $0x10] sm:$0xff]  ;;  %v56_v7 = vld [vmem:[%s209_s3 + $0x8] sm:$0xff]  ;;  %s93_s14 = sshll.u32 %s137_s13, 4  ;;  %s95_s16 = sshll.u32 %s211_s5, 4  ;;  %s94_s14 = int_to_ptr.vmem [resolvable:$true] %s93_s14  ;;  %s96_s16 = int_to_ptr.hbm [resolvable:$true] %s95_s16 }
   0x5   :  { %v55_v8 = vld [vmem:[%s209_s3] sm:$0xff]  ;;  %vm86_vm1 = vcmask 9216  }
   0x6   :  { %48 = vmatpush.msra.mxu0 %v23_v2  ;;  %79 = vmatpush.msra.mxu1 %v57_v6  ;;  %v107_v9 = vld [vmem:[%s208_s2] ss:$0 sm:$0xff] }
   0x7   :  { %v108_v13 = vld [vmem:[%s210_s4] ss:$0 sm:$0xff] }
   0x8   :  { %49 = vmatpush.msra.mxu0 %v22_v3  ;;  %80 = vmatpush.msra.mxu1 %v56_v7 }
   0x9   :  { %104 = vmatmul.msk.f32.vlgmr.msra.gmra.mxu0 %vm30_vm0, %v21_v4 }
   0xa   :  { %81 = vmatpush.msra.mxu1 %v55_v8 }
  0x86   :  { %v51_v10 = vpop.f32.mrf.mxu0 }
  0x87   :  { %v52_v11 = vadd.f32 %v107_v9, %v51_v10 }
  0x89   :  { %109 = vtanh.f32 %v52_v11 }
  0x8f   :  { %v110_v12 = vpop.eup %109 }
  0x90   :  { %105 = vmatmul.msk.f32.vlgmr.msra.gmra.mxu1 %vm30_vm0, %v110_v12 }
 0x10d   :  { %v83_v14 = vpop.f32.mrf.mxu1 }
 0x10e   :  { %v84_v15 = vadd.f32 %v108_v13, %v83_v14 }
 0x110   :  { %87 = vst.msk [vmem:[#allocation2] sm:$0x3] %vm86_vm1, %v84_v15 }
 0x111   :  { %98 = dma.vmem_to_hbm [thread:$0]  %s94_s14, 32, %s96_s16, [#allocation3]  }
 0x112   :  { %135 = dma.done.wait [#allocation3], 32  }
 0x113   :  { %136 = vsyncadd [#allocation3], 4294967264 }
 0x114   :  { %103 = vsyncpa [#allocation3], 1 }

// kernel: xlnet_forward.3
= control target key start
LH: loop header
LB: loop body
LE: loop exit
PB: predicated region body
PF: predicated region fallthrough
CT: control target
= control target key end

     0   :  { %s1107_s13 = smov 0   ;;  %s1296_s0 = inlined_call_operand.vmem [shape: f32[2,8,32], index: 0, kind: input, shape index: {}]   ;;  %s1297_s1 = inlined_call_operand.vmem [shape: f32[2,8,8], index: 1, kind: input, shape index: {}]   ;;  %s1298_s2 = inlined_call_operand.vmem [shape: f32[16,32], index: 2, kind: input, shape index: {}]   ;;  %s1299_s3 = inlined_call_operand.vmem [shape: f32[32,128], index: 3, kind: input, shape index: {}]   ;;  %s1300_s4 = inlined_call_operand.vmem [shape: f32[4,16], index: 4, kind: input, shape index: {}]   ;;  %s1301_s5 = inlined_call_operand.vmem [shape: f32[32,32], index: 5, kind: input, shape index: {}]   ;;  %s1302_s6 = inlined_call_operand.vmem [shape: f32[32,64], index: 6, kind: input, shape index: {}]   ;;  %s1303_s7 = inlined_call_operand.vmem [shape: f32[1,64], index: 7, kind: input, shape index: {}]   ;;  %s1304_s8 = inlined_call_operand.vmem [shape: f32[64,32], index: 8, kind: input, shape index: {}]   ;;  %s1305_s9 = inlined_call_operand.vmem [shape: f32[5,32], index: 9, kind: input, shape index: {}]   ;;  %s1306_s10 = inlined_call_operand.vmem [shape: f32[2,8,32], index: 10, kind: output, shape index: {}]  }
   0x1 LB: > { %s959_s14 = sadd.s32 4294967295, %s1034_s13   ;;  %p963_p0 = scmp.ge.s32.totalorder %s1034_s13, 1  ;;  %s1034_s13 = sphi %s1107_s13, %s20_s13  }
   0x2   : > { %p320_p1 = scmp.lt.s32.totalorder %s1034_s13, 3 }
   0x4   : > { %p321_p2 = pnand %p963_p0, %p320_p1 }
   0x5   : > { %p360_p3 = scmp.lt.s32.totalorder (!%p321_p2), %s959_s14, 1  ;;  %s1036_s11 = smov (!%p321_p2), 96  }
   0x6   : > { %324 = sbr.rel (%p321_p2) target bundleno = 2487 (0x9b7), region = 60  ;;  %s1037_s12 = smov (!%p321_p2), 32  }
   0x7   : > { %s1038_s16 = smov (!%p321_p2), 4   ;;  %s1039_s17 = smov (!%p321_p2), 2  }
   0x8   : > { %s1040_s18 = smov (!%p321_p2), 1   ;;  %s1041_s19 = smov (!%p321_p2), 7  }
   0x9   : > { %s1042_s20 = smov (!%p321_p2), 3   ;;  %s1043_s21 = smov (!%p321_p2), 5  }
   0xa   : > { %s1044_s22 = smov (!%p321_p2), 16   ;;  %s1045_s24 = smov (!%p321_p2), 6  }
   0xb   : > { %v377_v0 = vld [vmem:[%s1299_s3 + $0x18] sm:$0xff]  ;;  %v376_v1 = vld [vmem:[%s1299_s3 + $0x10] sm:$0xff]  ;;  %v375_v2 = vld [vmem:[%s1299_s3 + $0x8] sm:$0xff]  ;;  %s1308_s14 = smov (!%p360_p3, %s959_s14), 1  ;;  %vm380_vm0 = vcmask 261120   ;;  %vm446_vm1 = vcmask 130048  }
   0xc   : > { %424 = vmatpush.msra.mxu1 %v377_v0  ;;  %396 = vmatpush.msra.mxu0 %v377_v0  ;;  %v374_v3 = vld [vmem:[%s1299_s3] sm:$0xff]  ;;  %s1127_s23 = sshll.u32 %s1308_s14, 3  ;;  %v405_v6 = vld [vmem:[%s1298_s2 + $0x8] sm:$0xff]  ;;  %s1046_s25 = smov 64   ;;  %vm496_vm2 = vcmask 1040384   ;;  %vm498_vm3 = vcmask 1041408  }
   0xd   : > { %v404_v4 = vld [vmem:[%s1298_s2] sm:$0xff]  ;;  %s363_s28 = scalar_lea.vmem %s1296_s0, %s1127_s23  ;;  %s1047_s26 = smov 80   ;;  %vm500_vm4 = vcmask 1042432   ;;  %vm502_vm5 = vcmask 1043456   ;;  %vm504_vm6 = vcmask 1044480   ;;  %vm506_vm7 = vcmask 1045504  }
   0xe   : > { %425 = vmatpush.msra.mxu1 %v376_v1  ;;  %397 = vmatpush.msra.mxu0 %v376_v1  ;;  %v1136_v5 = vld [vmem:[%s363_s28] sm:$0xff]  ;;  %vm508_vm8 = vcmask 1046528   ;;  %s1048_s27 = smov 120   ;;  %s1049_s28 = smov 112   ;;  %vm544_vm9 = vcmask 64512   ;;  %vm842_vm14 = vcmask 523264  }
   0xf   : > { %v378_v10 = vld [vmem:[%s1300_s4] sm:$0xf] }
  0x10   : > { %426 = vmatpush.msra.mxu1 %v375_v2  ;;  %398 = vmatpush.msra.mxu0 %v375_v2  ;;  %v436_v11 = vperm.slane %v378_v10, 0  ;;  %v438_v15 = vperm.slane %v378_v10, 2  ;;  %v588_v19 = vperm.slane %v378_v10, 3  ;;  %v582_v20 = vperm.slane %v378_v10, 1 }
  0x12   : > { %427 = vmatpush.msra.mxu1 %v374_v3  ;;  %399 = vmatpush.msra.mxu0 %v374_v3 }
  0x13   : > { %968 = vmatmul.msk.f32.vlgmr.msra.gmra.mxu1 %vm380_vm0, %v404_v4  ;;  %967 = vmatmul.msk.f32.vlgmr.msra.gmra.mxu0 %vm380_vm0, %v1136_v5 }
  0x1b   : > { %969 = vmatmul.msk.f32.gmra.mxu1 %vm380_vm0, %v405_v6 }
  0x90   : > { %v429_v7 = vpop.f32.mrf.mxu1  ;;  %v1145_v8 = vpop.f32.mrf.mxu0 }
  0x91   : > { %511 = vrot.lane.b32.xlu1 %v1145_v8, %s1036_s11  ;;  %v437_v13 = vadd.f32 %v436_v11, %v1145_v8  ;;  %v439_v17 = vadd.f32 %v438_v15, %v1145_v8  ;;  %s367_s11 = scalar_lea.vmem %s1297_s1, %s1127_s23 }
  0x92   : > { %v373_v43 = vld [vmem:[%s367_s11] sm:$0xff] }
  0x93   : > { %v435_v47 = vmul.f32 -1e+30, %v373_v43 }
  0x98   : > { %v432_v9 = vpop.f32.mrf.mxu1 }
  0x99   : > { %444 = vrot.lane.b32.xlu0 %v432_v9, %s1037_s12 }
  0xa1   : > { %442 = vrot.lane.b32.xlu0 %v429_v7, %s1037_s12  ;;  %s1050_s12 = smov 48  }
 0x103   : > { %v512_v12 = vpop.permute.xlu1 %511 }
 0x104   : > { %973 = vmatpush.xpose.msk.msra.mxu3 %vm446_vm1, %v512_v12 }
 0x107   : > { %974 = vmatmul.msk.f32.vlgmr.msra.gmra.mxu3 %vm446_vm1, %v437_v13 }
 0x10b   : > { %v445_v14 = vpop.permute.xlu0 %444 }
 0x10c   : > { %970 = vmatpush.xpose.msk.msra.mxu2 %vm446_vm1, %v445_v14 }
 0x113   : > { %v443_v16 = vpop.permute.xlu0 %442 }
 0x114   : > { %971 = vmatpush.xpose.msk.msra.mxu2 %vm446_vm1, %v443_v16 }
 0x117   : > { %972 = vmatmul.msk.f32.vlgmr.msra.gmra.mxu2 %vm446_vm1, %v439_v17 }
 0x18a   : > { %v539_v44 = vpop.f32.mrf.mxu3 }
 0x19a   : > { %v471_v18 = vpop.f32.mrf.mxu2 }
 0x19b   : > { %484 = vrot.lane.b32.xlu0 %v471_v18, %s1038_s16  ;;  %478 = vrot.lane.b32.xlu2 %v471_v18, %s1039_s17 }
 0x19c   : > { %475 = vrot.lane.b32.xlu1 %v471_v18, %s1040_s18 }
 0x1a3   : > { %493 = vrot.lane.b32.xlu0 %v471_v18, %s1041_s19  ;;  %481 = vrot.lane.b32.xlu2 %v471_v18, %s1042_s20 }
 0x1a4   : > { %487 = vrot.lane.b32.xlu1 %v471_v18, %s1043_s21 }
 0x1ab   : > { %599 = vrot.lane.b32.xlu0 %v432_v9, %s1044_s22  ;;  %490 = vrot.lane.b32.xlu2 %v471_v18, %s1045_s24 }
 0x1ac   : > { %590 = vrot.lane.b32.xlu1 %v588_v19, %s1044_s22 }
 0x1b4   : > { %597 = vrot.lane.b32.xlu1 %v429_v7, %s1044_s22 }
 0x1bc   : > { %584 = vrot.lane.b32.xlu1 %v582_v20, %s1044_s22 }
 0x1c4   : > { %556 = vrot.lane.b32.xlu1 %v1145_v8, %s1046_s25 }
 0x1cc   : > { %659 = vrot.lane.b32.xlu1 %v1145_v8, %s1047_s26 }
 0x1f5   : > { %v479_v21 = vpop.permute.xlu2 %478 }
 0x1fd   : > { %v482_v22 = vpop.permute.xlu2 %481 }
 0x205   : > { %v491_v31 = vpop.permute.xlu2 %490 }
 0x20d   : > { %v485_v23 = vpop.permute.xlu0 %484 }
 0x20e   : > { %v476_v24 = vpop.permute.xlu1 %475 }
 0x20f   : > { %v497_v25 = vsel %vm496_vm2, %v471_v18, %v476_v24 }
 0x210   : > { %v499_v26 = vsel %vm498_vm3, %v497_v25, %v479_v21 }
 0x211   : > { %v501_v27 = vsel %vm500_vm4, %v499_v26, %v482_v22 }
 0x212   : > { %v503_v29 = vsel %vm502_vm5, %v501_v27, %v485_v23 }
 0x215   : > { %v494_v28 = vpop.permute.xlu0 %493 }
 0x216   : > { %v488_v30 = vpop.permute.xlu1 %487 }
 0x217   : > { %v505_v32 = vsel %vm504_vm6, %v503_v29, %v488_v30  ;;  %v736_v29 = vld [vmem:[%s1301_s5 + $0x18] sm:$0xff]  ;;  %v735_v30 = vld [vmem:[%s1301_s5 + $0x10] sm:$0xff] }
 0x218   : > { %v507_v33 = vsel %vm506_vm7, %v505_v32, %v491_v31  ;;  %v734_v31 = vld [vmem:[%s1301_s5 + $0x8] sm:$0xff]  ;;  %v733_v32 = vld [vmem:[%s1301_s5] sm:$0xff] }
 0x219   : > { %v509_v34 = vsel %vm508_vm8, %v507_v33, %v494_v28 }
 0x21a   : > { %514 = vrot.lane.b32.xlu2 %v509_v34, %s1048_s27 }
 0x21d   : > { %v600_v35 = vpop.permute.xlu0 %599 }
 0x21e   : > { %v591_v36 = vpop.permute.xlu1 %590  ;;  %976 = vmatpush.xpose.msk.msrb.mxu0 %vm446_vm1, %v600_v35 }
 0x21f   : > { %v593_v37 = vadd.f32 %v591_v36, %v1145_v8 }
 0x222   : > { %595 = vrot.lane.b32.xlu2 %v593_v37, %s1049_s28 }
 0x226   : > { %v598_v38 = vpop.permute.xlu1 %597 }
 0x227   : > { %977 = vmatpush.xpose.msk.msrb.mxu0 %vm446_vm1, %v598_v38 }
 0x22b   : > { %752 = vmatpush.msra.mxu0 %v736_v29 }
 0x22d   : > { %753 = vmatpush.msra.mxu0 %v735_v30 }
 0x22e   : > { %v585_v39 = vpop.permute.xlu1 %584 }
 0x22f   : > { %v587_v40 = vadd.f32 %v585_v39, %v1145_v8  ;;  %754 = vmatpush.msra.mxu0 %v734_v31  ;;  %v1051_v39 = vmov 32.0  }
 0x231   : > { %657 = vrot.lane.b32.xlu1 %v587_v40, %s1049_s28  ;;  %755 = vmatpush.msra.mxu0 %v733_v32 }
 0x236   : > { %v557_v41 = vpop.permute.xlu1 %556 }
 0x237   : > { %577 = vmatpush.msrb.mxu3 %v557_v41 }
 0x23e   : > { %v660_v42 = vpop.permute.xlu1 %659 }
 0x23f   : > { %979 = vmatpush.xpose.msk.msra.mxu3 %vm446_vm1, %v660_v42 }
 0x274   : > { %v515_v45 = vpop.permute.xlu2 %514 }
 0x275   : > { %v540_v46 = vadd.f32 %v539_v44, %v515_v45 }
 0x277   : > { %v542_v48 = vmul.f32 0.25, %v540_v46 }
 0x279   : > { %v543_v49 = vadd.f32 %v542_v48, %v435_v47 }
 0x27b   : > { %v545_v50 = vsel %vm544_vm9, %v543_v49, -inf }
 0x27c   : > { %v596_v51 = vpop.permute.xlu2 %595  ;;  %546 = vmax.xlane.f32.xlu0 %v545_v50  ;;  %v796_v50 = vld [vmem:[%s1302_s6 + $0x18] sm:$0xff] }
 0x27d   : > { %978 = vmatmul.msk.f32.vlgmr.msrb.gmra.mxu0 %vm446_vm1, %v596_v51  ;;  %816 = vmatpush.msrb.mxu1 %v796_v50  ;;  %v795_v51 = vld [vmem:[%s1302_s6 + $0x10] sm:$0xff] }
 0x27f   : > { %817 = vmatpush.msrb.mxu1 %v795_v51 }
 0x2a3   : > { %v658_v58 = vpop.permute.xlu1 %657 }
 0x2ef   : > { %v547_v52 = vpop.xlane.xlu0 %546 }
 0x2f0   : > { %v548_v53 = vsub.f32 %v543_v49, %v547_v52  ;;  %v794_v52 = vld [vmem:[%s1302_s6 + $0x8] sm:$0xff] }
 0x2f1   : > { %818 = vmatpush.msrb.mxu1 %v794_v52 }
 0x2f2   : > { %v549_v54 = vmul.f32 1.442695, %v548_v53  ;;  %v793_v53 = vld [vmem:[%s1302_s6] sm:$0xff] }
 0x2f3   : > { %819 = vmatpush.msrb.mxu1 %v793_v53 }
 0x2f4   : > { %1012 = vpow2.f32 %v549_v54 }
 0x2fa   : > { %v1013_v55 = vpop.eup %1012  ;;  %v624_v56 = vpop.f32.mrf.mxu0 }
 0x2fb   : > { %628 = vrot.lane.b32.xlu1 %v624_v56, %s1040_s18  ;;  %637 = vrot.lane.b32.xlu0 %v624_v56, %s1038_s16  ;;  %v551_v57 = vsel %vm544_vm9, %v1013_v55, 0.0  ;;  %s371_s16 = scalar_lea.vmem %s1306_s10, %s1127_s23 }
 0x2fc   : > { %552 = vadd.xlane.f32.xlu2 %v551_v57 }
 0x303   : > { %631 = vrot.lane.b32.xlu1 %v624_v56, %s1039_s17  ;;  %646 = vrot.lane.b32.xlu0 %v624_v56, %s1041_s19 }
 0x30b   : > { %640 = vrot.lane.b32.xlu1 %v624_v56, %s1043_s21 }
 0x313   : > { %643 = vrot.lane.b32.xlu1 %v624_v56, %s1045_s24 }
 0x314   : > { %634 = vrot.lane.b32.xlu2 %v624_v56, %s1042_s20 }
 0x36d   : > { %v629_v59 = vpop.permute.xlu1 %628  ;;  %v638_v0 = vpop.permute.xlu0 %637 }
 0x36e   : > { %v649_v1 = vsel %vm496_vm2, %v624_v56, %v629_v59 }
 0x36f   : > { %v553_v60 = vpop.xlane.xlu2 %552 }
 0x370   : > { %1014 = vrcp.f32 %v553_v60 }
 0x375   : > { %v632_v61 = vpop.permute.xlu1 %631  ;;  %v647_v11 = vpop.permute.xlu0 %646 }
 0x376   : > { %v1015_v62 = vpop.eup %1014  ;;  %v650_v3 = vsel %vm498_vm3, %v649_v1, %v632_v61 }
 0x377   : > { %v555_v63 = vmul.f32 %v1015_v62, %v1013_v55  ;;  %v635_v4 = vpop.permute.xlu2 %634  ;;  %v1249_v62 = vld [vmem:[%s1305_s9] sm:$0x1f] }
 0x378   : > { %v651_v6 = vsel %vm500_vm4, %v650_v3, %v635_v4  ;;  %v791_v3 = vperm.slane %v1249_v62, 1 }
 0x379   : > { %975 = vmatmul.msk.f32.vlgmr.msrb.gmra.mxu3 %vm544_vm9, %v555_v63  ;;  %v652_v7 = vsel %vm502_vm5, %v651_v6, %v638_v0  ;;  %v789_v0 = vperm.slane %v1249_v62, 0 }
 0x37d   : > { %v641_v2 = vpop.permute.xlu1 %640 }
 0x37e   : > { %v653_v9 = vsel %vm504_vm6, %v652_v7, %v641_v2  ;;  %v840_v7 = vld [vmem:[%s1304_s8 + $0x38] sm:$0xff] }
 0x37f   : > { %854 = vmatpush.msrb.mxu2 %v840_v7 }
 0x381   : > { %980 = vmatmul.msk.f32.vlgmr.msra.gmra.mxu3 %vm446_vm1, %v658_v58 }
 0x385   : > { %v644_v10 = vpop.permute.xlu1 %643 }
 0x386   : > { %v654_v12 = vsel %vm506_vm7, %v653_v9, %v644_v10  ;;  %v839_v9 = vld [vmem:[%s1304_s8 + $0x30] sm:$0xff]  ;;  %v838_v10 = vld [vmem:[%s1304_s8 + $0x28] sm:$0xff] }
 0x387   : > { %v655_v13 = vsel %vm508_vm8, %v654_v12, %v647_v11  ;;  %855 = vmatpush.msrb.mxu2 %v839_v9  ;;  %v837_v11 = vld [vmem:[%s1304_s8 + $0x20] sm:$0xff]  ;;  %v836_v12 = vld [vmem:[%s1304_s8 + $0x18] sm:$0xff] }
 0x388   : > { %662 = vrot.lane.b32.xlu1 %v655_v13, %s1048_s27  ;;  %v835_v13 = vld [vmem:[%s1304_s8 + $0x10] sm:$0xff] }
 0x389   : > { %856 = vmatpush.msrb.mxu2 %v838_v10 }
 0x38b   : > { %857 = vmatpush.msrb.mxu2 %v837_v11 }
 0x38d   : > { %858 = vmatpush.msrb.mxu2 %v836_v12 }
 0x38f   : > { %859 = vmatpush.msrb.mxu2 %v835_v13 }
 0x390   : > { %702 = vrot.lane.b32.xlu1 %v1145_v8, %s1050_s12 }
 0x3fa   : > { %v663_v14 = vpop.permute.xlu1 %662 }
 0x3fc   : > { %v579_v15 = vpop.f32.mrf.mxu3 }
 0x402   : > { %v703_v16 = vpop.permute.xlu1 %702 }
 0x403   : > { %723 = vmatpush.msrb.mxu3 %v703_v16  ;;  %v1011_v16 = vld [vmem:[%s1303_s7] ss:$0 sm:$0xff] }
 0x404   : > { %v686_v17 = vpop.f32.mrf.mxu3 }
 0x405   : > { %v687_v18 = vadd.f32 %v686_v17, %v663_v14  ;;  %v834_v14 = vld [vmem:[%s1304_s8 + $0x8] sm:$0xff] }
 0x406   : > { %860 = vmatpush.msrb.mxu2 %v834_v14 }
 0x407   : > { %v689_v19 = vmul.f32 0.25, %v687_v18 }
 0x409   : > { %v690_v20 = vadd.f32 %v689_v19, %v435_v47 }
 0x40b   : > { %v691_v21 = vsel %vm544_vm9, %v690_v20, -inf }
 0x40c   : > { %692 = vmax.xlane.f32.xlu2 %v691_v21 }
 0x47f   : > { %v693_v22 = vpop.xlane.xlu2 %692 }
 0x480   : > { %v694_v23 = vsub.f32 %v690_v20, %v693_v22 }
 0x482   : > { %v695_v24 = vmul.f32 1.442695, %v694_v23 }
 0x484   : > { %1016 = vpow2.f32 %v695_v24 }
 0x48a   : > { %v1017_v25 = vpop.eup %1016 }
 0x48b   : > { %v697_v26 = vsel %vm544_vm9, %v1017_v25, 0.0 }
 0x48c   : > { %698 = vadd.xlane.f32.xlu0 %v697_v26 }
 0x4ff   : > { %v699_v8 = vpop.xlane.xlu0 %698 }
 0x500   : > { %1018 = vrcp.f32 %v699_v8 }
 0x501   : > { %1020 = vrcp.f32 %v1051_v39 }
 0x506   : > { %v1019_v27 = vpop.eup %1018 }
 0x507   : > { %v701_v28 = vmul.f32 %v1019_v27, %v1017_v25  ;;  %v1021_v40 = vpop.eup %1020  ;;  %v841_v27 = vperm.slane %v1249_v62, 4 }
 0x508   : > { %v764_v41 = vmul.f32 32.0, %v1021_v40  ;;  %vm768_vm10 = vweird.f32 %v1021_v40 }
 0x509   : > { %981 = vmatmul.msk.f32.vlgmr.msrb.gmra.mxu3 %vm544_vm9, %v701_v28 }
 0x50a   : > { %v765_v42 = vsub.f32 1.0, %v764_v41 }
 0x50c   : > { %v766_v43 = vmul.f32 %v1021_v40, %v765_v42 }
 0x50e   : > { %v767_v44 = vadd.f32 %v1021_v40, %v766_v43 }
 0x510   : > { %v1229_v45 = vsel %vm768_vm10, %v1021_v40, %v767_v44 }
 0x58c   : > { %v725_v33 = vpop.f32.mrf.mxu3 }
 0x58d   : > { %729 = vrot.lane.b32.xlu1 %v725_v33, %s1044_s22 }
 0x5ff   : > { %v730_v34 = vpop.permute.xlu1 %729 }
 0x600   : > { %v732_v35 = vsel %vm446_vm1, %v579_v15, %v730_v34  ;;  %v833_v15 = vld [vmem:[%s1304_s8] sm:$0xff] }
 0x601   : > { %982 = vmatmul.msk.f32.vlgmr.msra.gmra.mxu0 %vm380_vm0, %v732_v35  ;;  %861 = vmatpush.msrb.mxu2 %v833_v15 }
 0x67e   : > { %v757_v36 = vpop.f32.mrf.mxu0 }
 0x67f   : > { %v758_v37 = vadd.f32 %v757_v36, %v1136_v5 }
 0x681   : > { %v760_v38 = vsel %vm380_vm0, %v758_v37, 0.0 }
 0x682   : > { %761 = vadd.xlane.f32.xlu1 %v760_v38 }
 0x6f5   : > { %v762_v46 = vpop.xlane.xlu1 %761 }
 0x6f6   : > { %v770_v47 = vmul.f32 %v1229_v45, %v762_v46 }
 0x6f8   : > { %v771_v48 = vsub.f32 %v758_v37, %v770_v47  ;;  %v889_v47 = vperm.slane %v1249_v62, 2 }
 0x6fa   : > { %v772_v49 = vmul.f32 %v771_v48, %v771_v48 }
 0x6fc   : > { %v773_v5 = vsel %vm380_vm0, %v772_v49, 0.0  ;;  %v891_v49 = vperm.slane %v1249_v62, 3 }
 0x6fd   : > { %774 = vadd.xlane.f32.xlu2 %v773_v5 }
 0x770   : > { %v775_v54 = vpop.xlane.xlu2 %774 }
 0x771   : > { %v776_v55 = vmul.f32 %v775_v54, %v1229_v45 }
 0x773   : > { %v777_v56 = vadd.f32 1e-12, %v776_v55 }
 0x775   : > { %1022 = vrsqrt.f32 %v777_v56  ;;  %vm784_vm12 = vweird.f32 %v777_v56 }
 0x77b   : > { %v1023_v57 = vpop.eup %1022 }
 0x77c   : > { %v779_v58 = vmul.f32 %v1023_v57, %v777_v56  ;;  %vm785_vm11 = vweird.f32 %v1023_v57 }
 0x77d   : > { %vm786_vm13 = vmor %vm784_vm12, %vm785_vm11 }
 0x77e   : > { %v780_v59 = vmul.f32 %v1023_v57, %v779_v58 }
 0x780   : > { %v781_v60 = vmul.f32 0.5, %v780_v59 }
 0x782   : > { %v782_v61 = vsub.f32 1.5, %v781_v60 }
 0x784   : > { %v783_v63 = vmul.f32 %v1023_v57, %v782_v61 }
 0x786   : > { %v787_v1 = vsel %vm786_vm13, %v1023_v57, %v783_v63 }
 0x787   : > { %v788_v2 = vmul.f32 %v787_v1, %v771_v48 }
 0x789   : > { %v790_v4 = vmul.f32 %v789_v0, %v788_v2 }
 0x78b   : > { %v792_v6 = vadd.f32 %v791_v3, %v790_v4 }
 0x78d   : > { %983 = vmatmul.msk.f32.vlgmr.msrb.gmra.mxu1 %vm380_vm0, %v792_v6 }
 0x80a   : > { %v821_v17 = vpop.f32.mrf.mxu1 }
 0x80b   : > { %v822_v18 = vadd.f32 %v1011_v16, %v821_v17 }
 0x80d   : > { %v825_v19 = vmul.f32 0.044715, %v822_v18  ;;  %v824_v25 = vmul.f32 0.5, %v822_v18 }
 0x80f   : > { %v826_v20 = vmul.f32 %v825_v19, %v822_v18 }
 0x811   : > { %v827_v21 = vmul.f32 %v826_v20, %v822_v18 }
 0x813   : > { %v828_v22 = vadd.f32 %v827_v21, %v822_v18 }
 0x815   : > { %v829_v23 = vmul.f32 0.7978846, %v828_v22 }
 0x817   : > { %1024 = vtanh.f32 %v829_v23 }
 0x81d   : > { %v1025_v24 = vpop.eup %1024 }
 0x81e   : > { %v831_v26 = vadd.f32 1.0, %v1025_v24 }
 0x820   : > { %v832_v8 = vmul.f32 %v831_v26, %v824_v25 }
 0x822   : > { %984 = vmatmul.msk.f32.vlgmr.msrb.gmra.mxu2 %vm842_vm14, %v832_v8 }
 0x8a5   : > { %v863_v28 = vpop.f32.mrf.mxu2 }
 0x8a6   : > { %v864_v29 = vadd.f32 %v863_v28, %v841_v27 }
 0x8a8   : > { %v866_v30 = vadd.f32 %v864_v29, %v792_v6 }
 0x8aa   : > { %v867_v31 = vsel %vm380_vm0, %v866_v30, 0.0 }
 0x8ab   : > { %868 = vadd.xlane.f32.xlu0 %v867_v31 }
 0x91e   : > { %v869_v32 = vpop.xlane.xlu0 %868 }
 0x91f   : > { %v870_v33 = vmul.f32 %v869_v32, %v1229_v45 }
 0x921   : > { %v871_v34 = vsub.f32 %v866_v30, %v870_v33 }
 0x923   : > { %v872_v35 = vmul.f32 %v871_v34, %v871_v34 }
 0x925   : > { %v873_v36 = vsel %vm380_vm0, %v872_v35, 0.0 }
 0x926   : > { %874 = vadd.xlane.f32.xlu2 %v873_v36 }
 0x999   : > { %v875_v37 = vpop.xlane.xlu2 %874 }
 0x99a   : > { %v876_v38 = vmul.f32 %v875_v37, %v1229_v45 }
 0x99c   : > { %v877_v39 = vadd.f32 1e-12, %v876_v38 }
 0x99e   : > { %1026 = vrsqrt.f32 %v877_v39  ;;  %vm884_vm1 = vweird.f32 %v877_v39 }
 0x9a4   : > { %v1027_v40 = vpop.eup %1026 }
 0x9a5   : > { %v879_v41 = vmul.f32 %v1027_v40, %v877_v39  ;;  %vm885_vm15 = vweird.f32 %v1027_v40 }
 0x9a6   : > { %vm886_vm2 = vmor %vm884_vm1, %vm885_vm15 }
 0x9a7   : > { %v880_v42 = vmul.f32 %v1027_v40, %v879_v41 }
 0x9a9   : > { %v881_v43 = vmul.f32 0.5, %v880_v42 }
 0x9ab   : > { %v882_v44 = vsub.f32 1.5, %v881_v43 }
 0x9ad   : > { %v883_v46 = vmul.f32 %v1027_v40, %v882_v44 }
 0x9af   : > { %v887_v48 = vsel %vm886_vm2, %v1027_v40, %v883_v46 }
 0x9b0   : > { %v888_v5 = vmul.f32 %v887_v48, %v871_v34 }
 0x9b2   : > { %v890_v50 = vmul.f32 %v889_v47, %v888_v5 }
 0x9b4   : > { %v892_v45 = vadd.f32 %v891_v49, %v890_v50 }
 0x9b6   : > { %893 = vst.msk [vmem:[%s371_s16] sm:$0xff] %vm380_vm0, %v892_v45 }
 0x9b7 PF: > { %s20_s13 = sadd.s32 1, %s1034_s13  }
 0x9b8   : > { %p17_p4 = scmp.ge.s32.totalorder %s20_s13, 4  }
 0x9ba   :  { %19 = sbr.rel (!%p17_p4) target bundleno = 1 (0x1), region = 93 }

</bundles_post_ra>
